<compile_context>
chip_gen: v7x
topology: tpu7x:2x2x1
jax: 0.10.0
libtpu: 0.0.40
codegen_flags: <defaults>
</compile_context>

<pallas_src>
import functools
import math

import jax
import jax.numpy as jnp
from jax.experimental import pallas as pl
from jax.experimental.pallas import tpu as pltpu


# ----------------------------------------------------------------------------
# Fused kernel: 3x GraphConvolution + scatter-max pooling + scaling + classifier
# ----------------------------------------------------------------------------
def gcn_binary_kernel(x_ref, adjbd_ref, clmask_ref, scaleflat_ref,
                      w1_ref, w2_ref, w3_ref, fc1w_ref, vec_ref,
                      out_ref, flat_scratch, *,
                      batch, n_nodes, cluster_num, fc_in_dim, f1, f2, hidden):
    adj_bd = adjbd_ref[...]                              # (B*N, B*N) bf16 block-diag

    # Packed 1-row parameters (static slices, lane offset 0 -> no lane shuffles).
    b1    = vec_ref[0:1, 0:f1]
    b2    = vec_ref[1:2, 0:f2]
    b3    = vec_ref[2:3, 0:fc_in_dim]
    fc1_b = vec_ref[3:4, 0:hidden]
    fc2_w = vec_ref[4:5, 0:hidden]
    fc2_b = vec_ref[5:6, 0:1]

    def gconv(h_bf16, w_ref, bias):
        # support = h @ W ; output = adj_bd @ support + bias   (all 2-D, bf16 MXU)
        support = jnp.dot(h_bf16, w_ref[...], preferred_element_type=jnp.float32)
        out = jnp.dot(adj_bd, support.astype(jnp.bfloat16),
                      preferred_element_type=jnp.float32)
        return out + bias

    h = jnp.maximum(gconv(x_ref[...], w1_ref, b1), 0.0)        # gc1 + ReLU
    # (dropout omitted: inference mode)
    h = jnp.maximum(gconv(h.astype(jnp.bfloat16), w2_ref, b2), 0.0)   # gc2 + ReLU
    h = gconv(h.astype(jnp.bfloat16), w3_ref, b3)              # gc3 -> (B*N, FC) f32
    h3 = h.reshape(batch, n_nodes, fc_in_dim)                  # (B, N, FC)

    # scatter(h, groups, dim=1, reduce='max'): per-cluster masked max via a
    # host-built additive sentinel mask; results land at static lane offsets
    # in a VMEM scratch slab (no cross-lane concatenate).
    for c in range(cluster_num):                               # static unroll (C small)
        m = clmask_ref[c]                                      # (B, N): 0 or -1e30
        pc = jnp.max(h3 + m[:, :, None], axis=1)               # (B, FC)
        flat_scratch[:, c * fc_in_dim:(c + 1) * fc_in_dim] = pc

    # * in_node_num * mask * has_node (all folded on host into scale_flat).
    flat = (flat_scratch[...] * scaleflat_ref[...]).astype(jnp.bfloat16)  # (B, C*FC)

    # concat_and_classify: Linear(+folded BN) -> ReLU -> Linear(512,1) -> sigmoid
    hid = jnp.dot(flat, fc1w_ref[...], preferred_element_type=jnp.float32)
    hid = jnp.maximum(hid + fc1_b, 0.0)
    # final (512 -> 1) projection as a lane reduction (avoids a 1-wide MXU matmul)
    logit = jnp.sum(hid * fc2_w, axis=-1, keepdims=True) + fc2_b
    out_ref[...] = 1.0 / (1.0 + jnp.exp(-logit))               # sigmoid


# ----------------------------------------------------------------------------
# Wrapper: host-side folding (block-diag adj, cluster masks, BN, bf16 casts)
# + a single pallas_call
# ----------------------------------------------------------------------------
def gcn_binary_forward(x, adj, mask, in_node_num, groups, params,
                       *, cluster_num, fc_in_dim):
    b, n_nodes, f0 = x.shape
    f1, f2 = 2 * f0, 4 * f0
    fc_in = cluster_num * fc_in_dim
    hidden = params["fc1_w"].shape[1]

    # --- block-diagonal adjacency: one (B*N, B*N) matmul instead of a bmm ---
    eye = jnp.eye(b, dtype=jnp.float32)
    adj_bd = (eye[:, None, :, None] * adj[:, :, None, :]
              ).reshape(b * n_nodes, b * n_nodes).astype(jnp.bfloat16)
    x2d = x.reshape(b * n_nodes, f0).astype(jnp.bfloat16)

    # --- cluster masks / scale (host side) ---
    gi = groups.astype(jnp.int32)
    onehot = gi[None, :, :] == jnp.arange(cluster_num, dtype=jnp.int32)[:, None, None]
    clmask = jnp.where(onehot, 0.0, -1e30).astype(jnp.float32)       # (C, B, N)
    has_node = jnp.any(onehot, axis=2).astype(jnp.float32).T         # (B, C)
    scale = (in_node_num * mask * has_node).astype(jnp.float32)      # (B, C)
    scale_flat = jnp.repeat(scale, fc_in_dim, axis=1)                # (B, C*FC)

    # --- fold eval-mode BatchNorm1d into fc1, cast MXU operands to bf16 ---
    g = params["bn_gamma"] * jax.lax.rsqrt(params["bn_var"] + 1e-5)  # (1, hidden)
    fc1_w = (params["fc1_w"] * g).astype(jnp.bfloat16)               # (fc_in, hidden)
    fc1_b = (params["fc1_b"] - params["bn_mean"]) * g + params["bn_beta"]
    w1 = params["w1"].astype(jnp.bfloat16)
    w2 = params["w2"].astype(jnp.bfloat16)
    w3 = params["w3"].astype(jnp.bfloat16)

    # --- pack the six 1-row params into one (6, vw) array: fewer tiny DMAs ---
    vw = max(hidden, f1, f2, fc_in_dim)

    def row(v):
        v = jnp.asarray(v, jnp.float32).reshape(1, -1)
        return jnp.pad(v, ((0, 0), (0, vw - v.shape[1])))

    vecs = jnp.concatenate([row(params["b1"]), row(params["b2"]), row(params["b3"]),
                            row(fc1_b), row(params["fc2_w"].reshape(1, hidden)),
                            row(params["fc2_b"])], axis=0)           # (6, vw) f32

    full = lambda shp: pl.BlockSpec(shp, lambda i, _n=len(shp): (0,) * _n)

    kernel = functools.partial(gcn_binary_kernel, batch=b, n_nodes=n_nodes,
                               cluster_num=cluster_num, fc_in_dim=fc_in_dim,
                               f1=f1, f2=f2, hidden=hidden)

    return pl.pallas_call(
        kernel,
        out_shape=jax.ShapeDtypeStruct((b, 1), jnp.float32),
        grid=(1,),  # whole (tiny) batch in one step: no per-batch grid overhead
        in_specs=[
            full((b * n_nodes, f0)),             # x (2-D, bf16)
            full((b * n_nodes, b * n_nodes)),    # block-diag adjacency (bf16)
            full((cluster_num, b, n_nodes)),     # additive cluster mask
            full((b, fc_in)),                    # in_node_num*mask*has_node, lane-dense
            full((f0, f1)),                      # gc1 W (bf16)
            full((f1, f2)),                      # gc2 W (bf16)
            full((f2, fc_in_dim)),               # gc3 W (bf16)
            full((fc_in, hidden)),               # fc1 W (BN folded, bf16)
            full((6, vw)),                       # packed b1,b2,b3,fc1_b,fc2_w,fc2_b
        ],
        out_specs=full((b, 1)),
        scratch_shapes=[pltpu.VMEM((b, fc_in), jnp.float32)],   # pooled slab
        compiler_params=pltpu.CompilerParams(
            dimension_semantics=("arbitrary",)),
    )(x2d, adj_bd, clmask, scale_flat, w1, w2, w3, fc1_w, vecs)


# ----------------------------------------------------------------------------
# Deterministic parameter init (mirrors GraphConvolution.reset_parameters /
# Linear / BatchNorm shapes; values are synthetic).
# ----------------------------------------------------------------------------
def init_params(key, nfeat, fc_in_dim, cluster_num, hidden=512):
    f0, f1, f2 = nfeat, 2 * nfeat, 4 * nfeat
    ks = jax.random.split(key, 10)

    def u(k, shape, stdv):
        return jax.random.uniform(k, shape, jnp.float32, -stdv, stdv)

    s1, s2, s3 = 1.0 / math.sqrt(f1), 1.0 / math.sqrt(f2), 1.0 / math.sqrt(fc_in_dim)
    fc_in = fc_in_dim * cluster_num
    return {
        "w1": u(ks[0], (f0, f1), s1), "b1": u(ks[1], (1, f1), s1),
        "w2": u(ks[2], (f1, f2), s2), "b2": u(ks[3], (1, f2), s2),
        "w3": u(ks[4], (f2, fc_in_dim), s3), "b3": u(ks[5], (1, fc_in_dim), s3),
        "fc1_w": jax.random.normal(ks[6], (fc_in, hidden), jnp.float32)
                 * math.sqrt(2.0 / (fc_in + hidden)),
        "fc1_b": jnp.zeros((1, hidden), jnp.float32),
        "bn_gamma": jnp.ones((1, hidden), jnp.float32),
        "bn_beta": jnp.zeros((1, hidden), jnp.float32),
        "bn_mean": jnp.zeros((1, hidden), jnp.float32),
        "bn_var": jnp.ones((1, hidden), jnp.float32),
        "fc2_w": jax.random.normal(ks[7], (hidden, 1), jnp.float32)
                 * math.sqrt(2.0 / (hidden + 1)),
        "fc2_b": jnp.zeros((1, 1), jnp.float32),
    }


# ----------------------------------------------------------------------------
# Pure-JAX f32 reference of the same forward pass (inference mode)
# ----------------------------------------------------------------------------
def reference_forward(x, adj, mask, in_node_num, groups, params,
                      *, cluster_num, fc_in_dim):
    def gc(h, w, bb):
        support = jnp.einsum('bij,jk->bik', h, w)
        return jnp.einsum('bij,bjk->bik', adj, support) + bb

    h = jax.nn.relu(gc(x, params["w1"], params["b1"]))
    h = jax.nn.relu(gc(h, params["w2"], params["b2"]))
    h = gc(h, params["w3"], params["b3"])                       # (B, N, FC)

    pooled = []
    for c in range(cluster_num):
        sel = (groups == c)[:, :, None]
        pc = jnp.max(jnp.where(sel, h, -jnp.inf), axis=1)
        has = jnp.any(groups == c, axis=1, keepdims=True)
        pooled.append(jnp.where(has, pc, 0.0))
    pooled = jnp.stack(pooled, axis=1)                          # (B, C, FC)
    pooled = pooled * in_node_num[:, :, None] * mask[:, :, None]
    flat = pooled.reshape(x.shape[0], -1)

    g = params["bn_gamma"] * jax.lax.rsqrt(params["bn_var"] + 1e-5)
    hid = flat @ (params["fc1_w"] * g) \
        + (params["fc1_b"] - params["bn_mean"]) * g + params["bn_beta"]
    hid = jax.nn.relu(hid)
    logit = hid @ params["fc2_w"] + params["fc2_b"]
    return jax.nn.sigmoid(logit)


if __name__ == "__main__":
    # Small shapes consistent with the module.
    B, N, NFEAT = 2, 16, 8
    FC_IN_DIM, CLUSTER_NUM = 16, 8       # fc_in = 128 (lane-dense)

    key = jax.random.PRNGKey(0)
    k_x, k_adj, k_mask, k_innum, k_params = jax.random.split(key, 5)

    x = jax.random.normal(k_x, (B, N, NFEAT), jnp.float32)
    adj = jax.random.uniform(k_adj, (B, N, N), jnp.float32)
    adj = adj / jnp.sum(adj, axis=-1, keepdims=True)          # row-normalized adj
    groups = jnp.tile(jnp.arange(N, dtype=jnp.int32) % CLUSTER_NUM, (B, 1))
    mask = jax.random.bernoulli(k_mask, 0.8, (B, CLUSTER_NUM)).astype(jnp.float32)
    in_node_num = jax.random.uniform(k_innum, (B, CLUSTER_NUM), jnp.float32,
                                     0.5, 2.0)

    params = init_params(k_params, NFEAT, FC_IN_DIM, CLUSTER_NUM)

    out = gcn_binary_forward(x, adj, mask, in_node_num, groups, params,
                             cluster_num=CLUSTER_NUM, fc_in_dim=FC_IN_DIM)
    out = jax.block_until_ready(out)

    ref = reference_forward(x, adj, mask, in_node_num, groups, params,
                            cluster_num=CLUSTER_NUM, fc_in_dim=FC_IN_DIM)

    assert out.shape == (B, 1)
    assert bool(jnp.all((out >= 0.0) & (out <= 1.0)))
    assert bool(jnp.allclose(out, ref, atol=5e-2))  # bf16 MXU vs f32 reference
    print("KERNEL_OK")
</pallas_src>

<mosaic_0001>
module attributes {stable_mosaic.version = 11 : i64} {
  func.func @gcn_binary_kernel(%arg0: i32, %arg1: memref<32x8xbf16, #tpu.memory_space<vmem>>, %arg2: memref<32x32xbf16, #tpu.memory_space<vmem>>, %arg3: memref<8x2x16xf32, #tpu.memory_space<vmem>>, %arg4: memref<2x128xf32, #tpu.memory_space<vmem>>, %arg5: memref<8x16xbf16, #tpu.memory_space<vmem>>, %arg6: memref<16x32xbf16, #tpu.memory_space<vmem>>, %arg7: memref<32x16xbf16, #tpu.memory_space<vmem>>, %arg8: memref<128x512xbf16, #tpu.memory_space<vmem>>, %arg9: memref<6x512xf32, #tpu.memory_space<vmem>>, %arg10: memref<2x1xf32, #tpu.memory_space<vmem>>, %arg11: memref<2x128xf32, #tpu.memory_space<vmem>>) attributes {dimension_semantics = [#tpu.dimension_semantics<arbitrary>], iteration_bounds = array<i64: 1>, scalar_prefetch = 0 : i64, scratch_operands = 1 : i64, tpu.core_type = #tpu.core_type<tc>, window_params = [{pipeline_mode = #tpu.pipeline_mode<synchronous>, transform_indices = @transform_0, window_bounds = array<i64: 32, 8>}, {pipeline_mode = #tpu.pipeline_mode<synchronous>, transform_indices = @transform_1, window_bounds = array<i64: 32, 32>}, {pipeline_mode = #tpu.pipeline_mode<synchronous>, transform_indices = @transform_2, window_bounds = array<i64: 8, 2, 16>}, {pipeline_mode = #tpu.pipeline_mode<synchronous>, transform_indices = @transform_3, window_bounds = array<i64: 2, 128>}, {pipeline_mode = #tpu.pipeline_mode<synchronous>, transform_indices = @transform_4, window_bounds = array<i64: 8, 16>}, {pipeline_mode = #tpu.pipeline_mode<synchronous>, transform_indices = @transform_5, window_bounds = array<i64: 16, 32>}, {pipeline_mode = #tpu.pipeline_mode<synchronous>, transform_indices = @transform_6, window_bounds = array<i64: 32, 16>}, {pipeline_mode = #tpu.pipeline_mode<synchronous>, transform_indices = @transform_7, window_bounds = array<i64: 128, 512>}, {pipeline_mode = #tpu.pipeline_mode<synchronous>, transform_indices = @transform_8, window_bounds = array<i64: 6, 512>}, {pipeline_mode = #tpu.pipeline_mode<synchronous>, transform_indices = @transform_9, window_bounds = array<i64: 2, 1>}]} {
    %c0 = arith.constant 0 : index
    %c0_0 = arith.constant 0 : index
    %0 = vector.load %arg2[%c0, %c0_0] : memref<32x32xbf16, #tpu.memory_space<vmem>>, vector<32x32xbf16>
    %c0_1 = arith.constant 0 : index
    %c0_2 = arith.constant 0 : index
    %1 = vector.load %arg9[%c0_1, %c0_2] : memref<6x512xf32, #tpu.memory_space<vmem>>, vector<1x16xf32>
    %c1 = arith.constant 1 : index
    %c0_3 = arith.constant 0 : index
    %2 = vector.load %arg9[%c1, %c0_3] : memref<6x512xf32, #tpu.memory_space<vmem>>, vector<1x32xf32>
    %c2 = arith.constant 2 : index
    %c0_4 = arith.constant 0 : index
    %3 = vector.load %arg9[%c2, %c0_4] : memref<6x512xf32, #tpu.memory_space<vmem>>, vector<1x16xf32>
    %c3 = arith.constant 3 : index
    %c0_5 = arith.constant 0 : index
    %4 = vector.load %arg9[%c3, %c0_5] : memref<6x512xf32, #tpu.memory_space<vmem>>, vector<1x512xf32>
    %c4 = arith.constant 4 : index
    %c0_6 = arith.constant 0 : index
    %5 = vector.load %arg9[%c4, %c0_6] : memref<6x512xf32, #tpu.memory_space<vmem>>, vector<1x512xf32>
    %c5 = arith.constant 5 : index
    %c0_7 = arith.constant 0 : index
    %6 = vector.load %arg9[%c5, %c0_7] : memref<6x512xf32, #tpu.memory_space<vmem>>, vector<1x1xf32>
    %c0_8 = arith.constant 0 : index
    %c0_9 = arith.constant 0 : index
    %7 = vector.load %arg1[%c0_8, %c0_9] : memref<32x8xbf16, #tpu.memory_space<vmem>>, vector<32x8xbf16>
    %c0_10 = arith.constant 0 : index
    %c0_11 = arith.constant 0 : index
    %8 = vector.load %arg5[%c0_10, %c0_11] : memref<8x16xbf16, #tpu.memory_space<vmem>>, vector<8x16xbf16>
    %cst = arith.constant dense<0.000000e+00> : vector<32x16xf32>
    %9 = tpu.matmul %7, %8, %cst {dimension_numbers = #tpu.dot_dimension_numbers<[1], [0], [0], [1], [0, 0, 1, 1], [], []>} : vector<32x8xbf16>, vector<8x16xbf16>, vector<32x16xf32> -> vector<32x16xf32>
    %10 = arith.truncf %9 : vector<32x16xf32> to vector<32x16xbf16>
    %cst_12 = arith.constant dense<0.000000e+00> : vector<32x16xf32>
    %11 = tpu.matmul %0, %10, %cst_12 {dimension_numbers = #tpu.dot_dimension_numbers<[1], [0], [0], [1], [0, 0, 1, 1], [], []>} : vector<32x32xbf16>, vector<32x16xbf16>, vector<32x16xf32> -> vector<32x16xf32>
    %12 = vector.broadcast %1 : vector<1x16xf32> to vector<32x16xf32>
    %13 = arith.addf %11, %12 : vector<32x16xf32>
    %cst_13 = arith.constant 0.000000e+00 : f32
    %14 = vector.broadcast %cst_13 : f32 to vector<32x16xf32>
    %15 = arith.maximumf %13, %14 : vector<32x16xf32>
    %16 = arith.truncf %15 : vector<32x16xf32> to vector<32x16xbf16>
    %c0_14 = arith.constant 0 : index
    %c0_15 = arith.constant 0 : index
    %17 = vector.load %arg6[%c0_14, %c0_15] : memref<16x32xbf16, #tpu.memory_space<vmem>>, vector<16x32xbf16>
    %cst_16 = arith.constant dense<0.000000e+00> : vector<32x32xf32>
    %18 = tpu.matmul %16, %17, %cst_16 {dimension_numbers = #tpu.dot_dimension_numbers<[1], [0], [0], [1], [0, 0, 1, 1], [], []>} : vector<32x16xbf16>, vector<16x32xbf16>, vector<32x32xf32> -> vector<32x32xf32>
    %19 = arith.truncf %18 : vector<32x32xf32> to vector<32x32xbf16>
    %cst_17 = arith.constant dense<0.000000e+00> : vector<32x32xf32>
    %20 = tpu.matmul %0, %19, %cst_17 {dimension_numbers = #tpu.dot_dimension_numbers<[1], [0], [0], [1], [0, 0, 1, 1], [], []>} : vector<32x32xbf16>, vector<32x32xbf16>, vector<32x32xf32> -> vector<32x32xf32>
    %21 = vector.broadcast %2 : vector<1x32xf32> to vector<32x32xf32>
    %22 = arith.addf %20, %21 : vector<32x32xf32>
    %cst_18 = arith.constant 0.000000e+00 : f32
    %23 = vector.broadcast %cst_18 : f32 to vector<32x32xf32>
    %24 = arith.maximumf %22, %23 : vector<32x32xf32>
    %25 = arith.truncf %24 : vector<32x32xf32> to vector<32x32xbf16>
    %c0_19 = arith.constant 0 : index
    %c0_20 = arith.constant 0 : index
    %26 = vector.load %arg7[%c0_19, %c0_20] : memref<32x16xbf16, #tpu.memory_space<vmem>>, vector<32x16xbf16>
    %cst_21 = arith.constant dense<0.000000e+00> : vector<32x16xf32>
    %27 = tpu.matmul %25, %26, %cst_21 {dimension_numbers = #tpu.dot_dimension_numbers<[1], [0], [0], [1], [0, 0, 1, 1], [], []>} : vector<32x32xbf16>, vector<32x16xbf16>, vector<32x16xf32> -> vector<32x16xf32>
    %28 = arith.truncf %27 : vector<32x16xf32> to vector<32x16xbf16>
    %cst_22 = arith.constant dense<0.000000e+00> : vector<32x16xf32>
    %29 = tpu.matmul %0, %28, %cst_22 {dimension_numbers = #tpu.dot_dimension_numbers<[1], [0], [0], [1], [0, 0, 1, 1], [], []>} : vector<32x32xbf16>, vector<32x16xbf16>, vector<32x16xf32> -> vector<32x16xf32>
    %30 = vector.broadcast %3 : vector<1x16xf32> to vector<32x16xf32>
    %31 = arith.addf %29, %30 : vector<32x16xf32>
    %32 = vector.shape_cast %31 : vector<32x16xf32> to vector<2x16x16xf32>
    %c0_23 = arith.constant 0 : index
    %c0_24 = arith.constant 0 : index
    %c0_25 = arith.constant 0 : index
    %33 = vector.load %arg3[%c0_23, %c0_24, %c0_25] : memref<8x2x16xf32, #tpu.memory_space<vmem>>, vector<1x2x16xf32>
    %34 = vector.shape_cast %33 : vector<1x2x16xf32> to vector<2x16xf32>
    %35 = vector.shape_cast %34 : vector<2x16xf32> to vector<2x16x1xf32>
    %36 = vector.broadcast %35 : vector<2x16x1xf32> to vector<2x16x16xf32>
    %37 = arith.addf %32, %36 : vector<2x16x16xf32>
    %cst_26 = arith.constant dense<0xFF800000> : vector<2x16xf32>
    %38 = vector.multi_reduction <maximumf>, %37, %cst_26 [1] : vector<2x16x16xf32> to vector<2x16xf32>
    %c0_27 = arith.constant 0 : index
    %c0_28 = arith.constant 0 : index
    %39 = vector.load %arg11[%c0_27, %c0_28] : memref<2x128xf32, #tpu.memory_space<vmem>>, vector<2x16xf32>
    tpu.vector_store %arg11[%c0_27, %c0_28], %38 {strides = array<i32>} : memref<2x128xf32, #tpu.memory_space<vmem>>, vector<2x16xf32>,
    %c1_29 = arith.constant 1 : index
    %c0_30 = arith.constant 0 : index
    %c0_31 = arith.constant 0 : index
    %40 = vector.load %arg3[%c1_29, %c0_30, %c0_31] : memref<8x2x16xf32, #tpu.memory_space<vmem>>, vector<1x2x16xf32>
    %41 = vector.shape_cast %40 : vector<1x2x16xf32> to vector<2x16xf32>
    %42 = vector.shape_cast %41 : vector<2x16xf32> to vector<2x16x1xf32>
    %43 = vector.broadcast %42 : vector<2x16x1xf32> to vector<2x16x16xf32>
    %44 = arith.addf %32, %43 : vector<2x16x16xf32>
    %cst_32 = arith.constant dense<0xFF800000> : vector<2x16xf32>
    %45 = vector.multi_reduction <maximumf>, %44, %cst_32 [1] : vector<2x16x16xf32> to vector<2x16xf32>
    %c0_33 = arith.constant 0 : index
    %c16 = arith.constant 16 : index
    %46 = vector.load %arg11[%c0_33, %c16] : memref<2x128xf32, #tpu.memory_space<vmem>>, vector<2x16xf32>
    tpu.vector_store %arg11[%c0_33, %c16], %45 {strides = array<i32>} : memref<2x128xf32, #tpu.memory_space<vmem>>, vector<2x16xf32>,
    %c2_34 = arith.constant 2 : index
    %c0_35 = arith.constant 0 : index
    %c0_36 = arith.constant 0 : index
    %47 = vector.load %arg3[%c2_34, %c0_35, %c0_36] : memref<8x2x16xf32, #tpu.memory_space<vmem>>, vector<1x2x16xf32>
    %48 = vector.shape_cast %47 : vector<1x2x16xf32> to vector<2x16xf32>
    %49 = vector.shape_cast %48 : vector<2x16xf32> to vector<2x16x1xf32>
    %50 = vector.broadcast %49 : vector<2x16x1xf32> to vector<2x16x16xf32>
    %51 = arith.addf %32, %50 : vector<2x16x16xf32>
    %cst_37 = arith.constant dense<0xFF800000> : vector<2x16xf32>
    %52 = vector.multi_reduction <maximumf>, %51, %cst_37 [1] : vector<2x16x16xf32> to vector<2x16xf32>
    %c0_38 = arith.constant 0 : index
    %c32 = arith.constant 32 : index
    %53 = vector.load %arg11[%c0_38, %c32] : memref<2x128xf32, #tpu.memory_space<vmem>>, vector<2x16xf32>
    tpu.vector_store %arg11[%c0_38, %c32], %52 {strides = array<i32>} : memref<2x128xf32, #tpu.memory_space<vmem>>, vector<2x16xf32>,
    %c3_39 = arith.constant 3 : index
    %c0_40 = arith.constant 0 : index
    %c0_41 = arith.constant 0 : index
    %54 = vector.load %arg3[%c3_39, %c0_40, %c0_41] : memref<8x2x16xf32, #tpu.memory_space<vmem>>, vector<1x2x16xf32>
    %55 = vector.shape_cast %54 : vector<1x2x16xf32> to vector<2x16xf32>
    %56 = vector.shape_cast %55 : vector<2x16xf32> to vector<2x16x1xf32>
    %57 = vector.broadcast %56 : vector<2x16x1xf32> to vector<2x16x16xf32>
    %58 = arith.addf %32, %57 : vector<2x16x16xf32>
    %cst_42 = arith.constant dense<0xFF800000> : vector<2x16xf32>
    %59 = vector.multi_reduction <maximumf>, %58, %cst_42 [1] : vector<2x16x16xf32> to vector<2x16xf32>
    %c0_43 = arith.constant 0 : index
    %c48 = arith.constant 48 : index
    %60 = vector.load %arg11[%c0_43, %c48] : memref<2x128xf32, #tpu.memory_space<vmem>>, vector<2x16xf32>
    tpu.vector_store %arg11[%c0_43, %c48], %59 {strides = array<i32>} : memref<2x128xf32, #tpu.memory_space<vmem>>, vector<2x16xf32>,
    %c4_44 = arith.constant 4 : index
    %c0_45 = arith.constant 0 : index
    %c0_46 = arith.constant 0 : index
    %61 = vector.load %arg3[%c4_44, %c0_45, %c0_46] : memref<8x2x16xf32, #tpu.memory_space<vmem>>, vector<1x2x16xf32>
    %62 = vector.shape_cast %61 : vector<1x2x16xf32> to vector<2x16xf32>
    %63 = vector.shape_cast %62 : vector<2x16xf32> to vector<2x16x1xf32>
    %64 = vector.broadcast %63 : vector<2x16x1xf32> to vector<2x16x16xf32>
    %65 = arith.addf %32, %64 : vector<2x16x16xf32>
    %cst_47 = arith.constant dense<0xFF800000> : vector<2x16xf32>
    %66 = vector.multi_reduction <maximumf>, %65, %cst_47 [1] : vector<2x16x16xf32> to vector<2x16xf32>
    %c0_48 = arith.constant 0 : index
    %c64 = arith.constant 64 : index
    %67 = vector.load %arg11[%c0_48, %c64] : memref<2x128xf32, #tpu.memory_space<vmem>>, vector<2x16xf32>
    tpu.vector_store %arg11[%c0_48, %c64], %66 {strides = array<i32>} : memref<2x128xf32, #tpu.memory_space<vmem>>, vector<2x16xf32>,
    %c5_49 = arith.constant 5 : index
    %c0_50 = arith.constant 0 : index
    %c0_51 = arith.constant 0 : index
    %68 = vector.load %arg3[%c5_49, %c0_50, %c0_51] : memref<8x2x16xf32, #tpu.memory_space<vmem>>, vector<1x2x16xf32>
    %69 = vector.shape_cast %68 : vector<1x2x16xf32> to vector<2x16xf32>
    %70 = vector.shape_cast %69 : vector<2x16xf32> to vector<2x16x1xf32>
    %71 = vector.broadcast %70 : vector<2x16x1xf32> to vector<2x16x16xf32>
    %72 = arith.addf %32, %71 : vector<2x16x16xf32>
    %cst_52 = arith.constant dense<0xFF800000> : vector<2x16xf32>
    %73 = vector.multi_reduction <maximumf>, %72, %cst_52 [1] : vector<2x16x16xf32> to vector<2x16xf32>
    %c0_53 = arith.constant 0 : index
    %c80 = arith.constant 80 : index
    %74 = vector.load %arg11[%c0_53, %c80] : memref<2x128xf32, #tpu.memory_space<vmem>>, vector<2x16xf32>
    tpu.vector_store %arg11[%c0_53, %c80], %73 {strides = array<i32>} : memref<2x128xf32, #tpu.memory_space<vmem>>, vector<2x16xf32>,
    %c6 = arith.constant 6 : index
    %c0_54 = arith.constant 0 : index
    %c0_55 = arith.constant 0 : index
    %75 = vector.load %arg3[%c6, %c0_54, %c0_55] : memref<8x2x16xf32, #tpu.memory_space<vmem>>, vector<1x2x16xf32>
    %76 = vector.shape_cast %75 : vector<1x2x16xf32> to vector<2x16xf32>
    %77 = vector.shape_cast %76 : vector<2x16xf32> to vector<2x16x1xf32>
    %78 = vector.broadcast %77 : vector<2x16x1xf32> to vector<2x16x16xf32>
    %79 = arith.addf %32, %78 : vector<2x16x16xf32>
    %cst_56 = arith.constant dense<0xFF800000> : vector<2x16xf32>
    %80 = vector.multi_reduction <maximumf>, %79, %cst_56 [1] : vector<2x16x16xf32> to vector<2x16xf32>
    %c0_57 = arith.constant 0 : index
    %c96 = arith.constant 96 : index
    %81 = vector.load %arg11[%c0_57, %c96] : memref<2x128xf32, #tpu.memory_space<vmem>>, vector<2x16xf32>
    tpu.vector_store %arg11[%c0_57, %c96], %80 {strides = array<i32>} : memref<2x128xf32, #tpu.memory_space<vmem>>, vector<2x16xf32>,
    %c7 = arith.constant 7 : index
    %c0_58 = arith.constant 0 : index
    %c0_59 = arith.constant 0 : index
    %82 = vector.load %arg3[%c7, %c0_58, %c0_59] : memref<8x2x16xf32, #tpu.memory_space<vmem>>, vector<1x2x16xf32>
    %83 = vector.shape_cast %82 : vector<1x2x16xf32> to vector<2x16xf32>
    %84 = vector.shape_cast %83 : vector<2x16xf32> to vector<2x16x1xf32>
    %85 = vector.broadcast %84 : vector<2x16x1xf32> to vector<2x16x16xf32>
    %86 = arith.addf %32, %85 : vector<2x16x16xf32>
    %cst_60 = arith.constant dense<0xFF800000> : vector<2x16xf32>
    %87 = vector.multi_reduction <maximumf>, %86, %cst_60 [1] : vector<2x16x16xf32> to vector<2x16xf32>
    %c0_61 = arith.constant 0 : index
    %c112 = arith.constant 112 : index
    %88 = vector.load %arg11[%c0_61, %c112] : memref<2x128xf32, #tpu.memory_space<vmem>>, vector<2x16xf32>
    tpu.vector_store %arg11[%c0_61, %c112], %87 {strides = array<i32>} : memref<2x128xf32, #tpu.memory_space<vmem>>, vector<2x16xf32>,
    %c0_62 = arith.constant 0 : index
    %c0_63 = arith.constant 0 : index
    %89 = vector.load %arg11[%c0_62, %c0_63] : memref<2x128xf32, #tpu.memory_space<vmem>>, vector<2x128xf32>
    %c0_64 = arith.constant 0 : index
    %c0_65 = arith.constant 0 : index
    %90 = vector.load %arg4[%c0_64, %c0_65] : memref<2x128xf32, #tpu.memory_space<vmem>>, vector<2x128xf32>
    %91 = arith.mulf %89, %90 : vector<2x128xf32>
    %92 = arith.truncf %91 : vector<2x128xf32> to vector<2x128xbf16>
    %c0_66 = arith.constant 0 : index
    %c0_67 = arith.constant 0 : index
    %93 = vector.load %arg8[%c0_66, %c0_67] : memref<128x512xbf16, #tpu.memory_space<vmem>>, vector<128x512xbf16>
    %cst_68 = arith.constant dense<0.000000e+00> : vector<2x512xf32>
    %94 = tpu.matmul %92, %93, %cst_68 {dimension_numbers = #tpu.dot_dimension_numbers<[1], [0], [0], [1], [0, 0, 1, 1], [], []>} : vector<2x128xbf16>, vector<128x512xbf16>, vector<2x512xf32> -> vector<2x512xf32>
    %95 = vector.broadcast %4 : vector<1x512xf32> to vector<2x512xf32>
    %96 = arith.addf %94, %95 : vector<2x512xf32>
    %cst_69 = arith.constant 0.000000e+00 : f32
    %97 = vector.broadcast %cst_69 : f32 to vector<2x512xf32>
    %98 = arith.maximumf %96, %97 : vector<2x512xf32>
    %99 = vector.broadcast %5 : vector<1x512xf32> to vector<2x512xf32>
    %100 = arith.mulf %98, %99 : vector<2x512xf32>
    %cst_70 = arith.constant dense<0.000000e+00> : vector<2xf32>
    %101 = vector.multi_reduction <add>, %100, %cst_70 [1] : vector<2x512xf32> to vector<2xf32>
    %102 = vector.shape_cast %101 : vector<2xf32> to vector<2x1xf32>
    %103 = vector.broadcast %6 : vector<1x1xf32> to vector<2x1xf32>
    %104 = arith.addf %102, %103 : vector<2x1xf32>
    %cst_71 = arith.constant 0.000000e+00 : f32
    %105 = vector.broadcast %cst_71 : f32 to vector<2x1xf32>
    %106 = arith.subf %105, %104 : vector<2x1xf32>
    %107 = math.exp %106 : vector<2x1xf32>
    %cst_72 = arith.constant 1.000000e+00 : f32
    %108 = vector.broadcast %cst_72 : f32 to vector<2x1xf32>
    %109 = arith.addf %108, %107 : vector<2x1xf32>
    %cst_73 = arith.constant 1.000000e+00 : f32
    %110 = vector.broadcast %cst_73 : f32 to vector<2x1xf32>
    %111 = arith.divf %110, %109 : vector<2x1xf32>
    %c0_74 = arith.constant 0 : index
    %c0_75 = arith.constant 0 : index
    %112 = vector.load %arg10[%c0_74, %c0_75] : memref<2x1xf32, #tpu.memory_space<vmem>>, vector<2x1xf32>
    tpu.vector_store %arg10[%c0_74, %c0_75], %111 {strides = array<i32>} : memref<2x1xf32, #tpu.memory_space<vmem>>, vector<2x1xf32>,
    return
  }
  func.func @transform_0(%arg0: i32) -> (i32, i32) {
    %c0_i32 = arith.constant 0 : i32
    %c0_i32_0 = arith.constant 0 : i32
    %c0_i32_1 = arith.constant 0 : i32
    return %c0_i32, %c0_i32_0 : i32, i32
  }
  func.func @transform_1(%arg0: i32) -> (i32, i32) {
    %c0_i32 = arith.constant 0 : i32
    %c0_i32_0 = arith.constant 0 : i32
    %c0_i32_1 = arith.constant 0 : i32
    return %c0_i32, %c0_i32_0 : i32, i32
  }
  func.func @transform_2(%arg0: i32) -> (i32, i32, i32) {
    %c0_i32 = arith.constant 0 : i32
    %c0_i32_0 = arith.constant 0 : i32
    %c0_i32_1 = arith.constant 0 : i32
    %c0_i32_2 = arith.constant 0 : i32
    return %c0_i32, %c0_i32_0, %c0_i32_1 : i32, i32, i32
  }
  func.func @transform_3(%arg0: i32) -> (i32, i32) {
    %c0_i32 = arith.constant 0 : i32
    %c0_i32_0 = arith.constant 0 : i32
    %c0_i32_1 = arith.constant 0 : i32
    return %c0_i32, %c0_i32_0 : i32, i32
  }
  func.func @transform_4(%arg0: i32) -> (i32, i32) {
    %c0_i32 = arith.constant 0 : i32
    %c0_i32_0 = arith.constant 0 : i32
    %c0_i32_1 = arith.constant 0 : i32
    return %c0_i32, %c0_i32_0 : i32, i32
  }
  func.func @transform_5(%arg0: i32) -> (i32, i32) {
    %c0_i32 = arith.constant 0 : i32
    %c0_i32_0 = arith.constant 0 : i32
    %c0_i32_1 = arith.constant 0 : i32
    return %c0_i32, %c0_i32_0 : i32, i32
  }
  func.func @transform_6(%arg0: i32) -> (i32, i32) {
    %c0_i32 = arith.constant 0 : i32
    %c0_i32_0 = arith.constant 0 : i32
    %c0_i32_1 = arith.constant 0 : i32
    return %c0_i32, %c0_i32_0 : i32, i32
  }
  func.func @transform_7(%arg0: i32) -> (i32, i32) {
    %c0_i32 = arith.constant 0 : i32
    %c0_i32_0 = arith.constant 0 : i32
    %c0_i32_1 = arith.constant 0 : i32
    return %c0_i32, %c0_i32_0 : i32, i32
  }
  func.func @transform_8(%arg0: i32) -> (i32, i32) {
    %c0_i32 = arith.constant 0 : i32
    %c0_i32_0 = arith.constant 0 : i32
    %c0_i32_1 = arith.constant 0 : i32
    return %c0_i32, %c0_i32_0 : i32, i32
  }
  func.func @transform_9(%arg0: i32) -> (i32, i32) {
    %c0_i32 = arith.constant 0 : i32
    %c0_i32_0 = arith.constant 0 : i32
    %c0_i32_1 = arith.constant 0 : i32
    return %c0_i32, %c0_i32_0 : i32, i32
  }
}

</mosaic_0001>

<bundles_post_ra>
// kernel: tpu_custom_call.1
= control target key start
LH: loop header
LB: loop body
LE: loop exit
PB: predicated region body
PF: predicated region fallthrough
CT: control target
= control target key end

     0   :  { %14 = vsyncpa [#allocation4], 0  ;;  %s1866_s0 = inlined_call_operand.vmem [shape: bf16[32,8], index: 0, kind: input, shape index: {}]   ;;  %s1867_s1 = inlined_call_operand.vmem [shape: bf16[32,32], index: 1, kind: input, shape index: {}]   ;;  %s1868_s2 = inlined_call_operand.hbm [shape: f32[8,2,16], index: 2, kind: input, shape index: {}]   ;;  %s1869_s3 = inlined_call_operand.vmem [shape: f32[2,128], index: 3, kind: input, shape index: {}]   ;;  %s1870_s4 = inlined_call_operand.hbm [shape: bf16[8,16], index: 4, kind: input, shape index: {}]   ;;  %s1871_s5 = inlined_call_operand.vmem [shape: bf16[16,32], index: 5, kind: input, shape index: {}]   ;;  %s1872_s6 = inlined_call_operand.vmem [shape: bf16[32,16], index: 6, kind: input, shape index: {}]   ;;  %s1873_s7 = inlined_call_operand.hbm [shape: bf16[128,512], index: 7, kind: input, shape index: {}]   ;;  %s1874_s8 = inlined_call_operand.vmem [shape: f32[6,512], index: 8, kind: input, shape index: {}]   ;;  %s1875_s9 = inlined_call_operand.vmem [shape: f32[2,1], index: 9, kind: output, shape index: {}]  }
   0x1   :  { %15 = vsyncpa [#allocation6], 0  ;;  %s1521_s30 = smov [#allocation5]   ;;  %s1522_s11 = smov [#allocation3]  }
   0x2   :  { %s40_s10 = sshll.u32 %s1521_s30, 4  ;;  %s25_s12 = sshll.u32 %s1522_s11, 4  ;;  %s41_s10 = int_to_ptr.vmem [resolvable:$true] %s40_s10  ;;  %s1584_s12 = int_to_ptr.vmem [resolvable:$true] %s25_s12 }
   0x3   :  { %s1451_s15 = scalar_lea.hbm %s1870_s4, 64 }
   0x4   :  { %p1452_p0 = scmp.ne.s32.totalorder %s1870_s4, %s1451_s15  ;;  %p1455_p1 = scmp.lt.u32.totalorder %s1451_s15, %s1870_s4 }
   0x6   :  { %p1457_p2 = pnand %p1455_p1, %p1452_p0 }
   0x8   :  { %1460 = shalt.err (!%p1457_p2)
}
   0x9   :  { %s1461_s20 = scalar_lea.vmem %s41_s10, 64  ;;  %p1466_p4 = scmp.lt.s32.totalorder %s41_s10, %s41_s10 }
   0xa   :  { %p1462_p3 = scmp.ne.s32.totalorder %s41_s10, %s1461_s20  ;;  %p1467_p5 = scmp.lt.s32.totalorder %s1461_s20, %s1461_s20 }
   0xc   :  { %p1468_p6 = por %p1467_p5, %p1466_p4 }
   0xe   :  { %p1469_p7 = pnand %p1468_p6, %p1462_p3 }
  0x10   :  { %1472 = shalt.err (!%p1469_p7)
}
  0x11   :  { %43 = dma.hbm_to_vmem [thread:$0]  %s1870_s4, 64, %s41_s10, [#allocation6]  }
  0x12   :  { %s1473_s25 = scalar_lea.hbm %s1868_s2, 256 }
  0x13   :  { %p1474_p8 = scmp.ne.s32.totalorder %s1868_s2, %s1473_s25  ;;  %p1477_p9 = scmp.lt.u32.totalorder %s1473_s25, %s1868_s2 }
  0x15   :  { %p1479_p10 = pnand %p1477_p9, %p1474_p8 }
  0x17   :  { %1482 = shalt.err (!%p1479_p10)
}
  0x18   :  { %s1483_s30 = scalar_lea.vmem %s1584_s12, 256  ;;  %p1488_p12 = scmp.lt.s32.totalorder %s1584_s12, %s1584_s12 }
  0x19   :  { %p1484_p11 = scmp.ne.s32.totalorder %s1584_s12, %s1483_s30  ;;  %p1489_p13 = scmp.lt.s32.totalorder %s1483_s30, %s1483_s30 }
  0x1b   :  { %p1490_p0 = por %p1489_p13, %p1488_p12 }
  0x1d   :  { %p1491_p1 = pnand %p1490_p0, %p1484_p11 }
  0x1f   :  { %1494 = shalt.err (!%p1491_p1)
}
  0x20   :  { %s1523_s4 = smov 32   ;;  %s1524_s10 = smov 2  }
  0x21   :  { %31 = dma.hbm_to_vmem [thread:$0]  %s1868_s2, 256, %s1584_s12, [#allocation4], %s1523_s4, %s1523_s4, %s1524_s10  }
  0x22   :  { %s1525_s14 = smov [#allocation7]   ;;  %s1495_s18 = scalar_lea.hbm %s1873_s7, 4096 }
  0x23   :  { %s53_s15 = sshll.u32 %s1525_s14, 4  ;;  %p1496_p2 = scmp.ne.s32.totalorder %s1873_s7, %s1495_s18  ;;  %s54_s15 = int_to_ptr.vmem [resolvable:$true] %s53_s15 }
  0x24   :  { %p1499_p3 = scmp.lt.u32.totalorder %s1495_s18, %s1873_s7 }
  0x26   :  { %p1501_p4 = pnand %p1499_p3, %p1496_p2 }
  0x28   :  { %1504 = shalt.err (!%p1501_p4)
}
  0x29   :  { %s1505_s23 = scalar_lea.vmem %s54_s15, 4096  ;;  %p1510_p6 = scmp.lt.s32.totalorder %s54_s15, %s54_s15 }
  0x2a   :  { %p1506_p5 = scmp.ne.s32.totalorder %s54_s15, %s1505_s23  ;;  %p1511_p7 = scmp.lt.s32.totalorder %s1505_s23, %s1505_s23 }
  0x2c   :  { %p1512_p8 = por %p1511_p7, %p1510_p6 }
  0x2e   :  { %p1513_p9 = pnand %p1512_p8, %p1506_p5 }
  0x30   :  { %1516 = shalt.err (!%p1513_p9)
}
  0x31   :  { %s1526_s2 = smov 256   ;;  %s1527_s12 = smov 16  }
  0x32   :  { %59 = dma.hbm_to_vmem [thread:$0]  %s1873_s7, 4096, %s54_s15, [#allocation6], %s1526_s2, %s1526_s2, %s1527_s12  }
  0x33   :  { %1517 = dma.done.wait [#allocation4], 256  }
  0x34   :  { %1518 = vsyncadd [#allocation4], 4294967040 }
  0x35   :  { %1519 = dma.done.wait [#allocation6], 4160  }
  0x36   :  { %1520 = vsyncadd [#allocation6], 4294963136  ;;  %vm106_vm0 = vcmask 1043456   ;;  %vm99_vm1 = vcmask 64512   ;;  %v88_v0 = vld [vmem:[#allocation5] sm:$0xf]  ;;  %v477_v51 = vlaneseq }
  0x37   :  { %1378 = vmatprep.subr.msk.bf16.mxu0 %vm106_vm0, %v88_v0  ;;  %v108_v1 = vsel %vm106_vm0, %v88_v0, 0  ;;  %v1392_v2 = vld [vmem:[%s1866_s0] sm:$0xff]   ;;  %v1393_v3 = vld [vmem:[%s1866_s0 + $0x8] sm:$0xff]   ;;  %vm171_vm2 = vcmask 261120   ;;  %vm241_vm3 = vcmask 130048   ;;  %vm523_vm4 = vcmask 1041409  }
  0x38   :  { %1335 = vmatpush3.bf16.msra.mxu0 %v108_v1  ;;  %1336 = vmatprep.mubr.msk.bf16.mxu0 %vm99_vm1, %v1392_v2  ;;  %v1394_v4 = vld [vmem:[%s1867_s1] sm:$0xff]   ;;  %v1643_v11 = vld [vmem:[%s1867_s1 + $0x8] sm:$0xff]   ;;  %v1670_v52 = vshrl.u32 %v477_v51, 7  ;;  %v637_v61 = vld [vmem:[#allocation3 + $0x6] sm:$0x3]  ;;  %s1529_s21 = smov 48  }
  0x39   :  { %1344 = vmatprep.mubr.msk.bf16.mxu1 %vm171_vm2, %v1394_v4  ;;  %v1396_v12 = vld [vmem:[%s1871_s5] sm:$0xff]   ;;  %v1398_v35 = vld [vmem:[%s1872_s6 + $0x8] sm:$0xff]   ;;  %v691_v0 = vld [vmem:[#allocation3 + $0x8] sm:$0x3]  ;;  %s1530_s22 = smov 96   ;;  %s1531_s23 = smov 80  }
  0x3a   :  { %1348 = vmatprep.subr.bf16.mxu0 %v1396_v12  ;;  %v76_v13 = vld [vmem:[%s1874_s8] ss:$0 sm:$0xff]  ;;  %v77_v36 = vld [vmem:[%s1874_s8 + $0x1] ss:$0 sm:$0xff]  ;;  %v529_v53 = vld [vmem:[#allocation3 + $0x2] sm:$0x3] }
  0x3b   :  { %1337 = vmatmul.mubr.msk.bf16.vlgmr.msra.gmra.mrb[0].mxu0 %vm99_vm1, %v1393_v3  ;;  %v1397_v34 = vld [vmem:[%s1872_s6] sm:$0xff]   ;;  %v1673_v54 = vsub.s32 0, %v1670_v52  ;;  %v1676_v55 = vsub.s32 1, %v1670_v52  ;;  %v583_v58 = vld [vmem:[#allocation3 + $0x4] sm:$0x3]  ;;  %s1533_s2 = smov 112  }
  0x3c   :  { %1349 = vmatpush3.bf16.msra.mxu0 %v1396_v12  ;;  %v745_v3 = vld [vmem:[#allocation3 + $0xa] sm:$0x3]  ;;  %vm526_vm5 = vcmask 123904   ;;  %vm580_vm6 = vcmask 255104   ;;  %vm634_vm7 = vcmask 386304   ;;  %vm688_vm8 = vcmask 517504  }
  0x3d   :  { %1362 = vmatprep.subr.bf16.mxu0 %v1397_v34  ;;  %v533_v56 = vrot.slane %v529_v53, %v1673_v54  ;;  %v544_v57 = vrot.slane %v529_v53, %v1676_v55  ;;  %v587_v59 = vrot.slane %v583_v58, %v1673_v54  ;;  %v598_v60 = vrot.slane %v583_v58, %v1676_v55 }
  0x3e   :  { %v641_v62 = vrot.slane %v637_v61, %v1673_v54  ;;  %v652_v63 = vrot.slane %v637_v61, %v1676_v55  ;;  %v695_v1 = vrot.slane %v691_v0, %v1673_v54  ;;  %v706_v2 = vrot.slane %v691_v0, %v1676_v55 }
  0x3f   :  { %535 = vbcast.lane.b32.xlu0 %v533_v56, 256  ;;  %546 = vbcast.lane.b32.xlu1 %v544_v57, 256  ;;  %vm742_vm9 = vcmask 648704   ;;  %vm796_vm10 = vcmask 779904   ;;  %vm850_vm11 = vcmask 911104   ;;  %vm904_vm12 = vcmask 1042304  }
  0x40   :  { %vm1234_vm13 = vcmask 1041408   ;;  %vm1251_vm14 = vcmask 1024  }
  0x43   :  { %539 = vbcast.lane.b32.xlu0 %v533_v56, 264  ;;  %550 = vbcast.lane.b32.xlu1 %v544_v57, 264 }
  0x47   :  { %589 = vbcast.lane.b32.xlu0 %v587_v59, 256  ;;  %593 = vbcast.lane.b32.xlu1 %v587_v59, 264 }
  0x4b   :  { %600 = vbcast.lane.b32.xlu0 %v598_v60, 256  ;;  %604 = vbcast.lane.b32.xlu1 %v598_v60, 264 }
  0x4f   :  { %643 = vbcast.lane.b32.xlu0 %v641_v62, 256  ;;  %647 = vbcast.lane.b32.xlu1 %v641_v62, 264  ;;  %v78_v62 = vld [vmem:[%s1874_s8 + $0x2] ss:$0 sm:$0xff] }
  0x53   :  { %654 = vbcast.lane.b32.xlu0 %v652_v63, 256  ;;  %658 = vbcast.lane.b32.xlu1 %v652_v63, 264 }
  0x57   :  { %697 = vbcast.lane.b32.xlu0 %v695_v1, 256  ;;  %701 = vbcast.lane.b32.xlu1 %v695_v1, 264 }
  0x5b   :  { %708 = vbcast.lane.b32.xlu0 %v706_v2, 256  ;;  %712 = vbcast.lane.b32.xlu1 %v706_v2, 264 }
 0x10e   :  { %v1338_v5 = vpop.f32.mrb[0].mxu0 }
 0x10f   :  { %v144_v6 = vpop.f32.mrb[1].mxu0 }
 0x110   :  { %v1339_v7 = vpop.f32.mrb[2].mxu0 }
 0x111   :  { %v160_v8 = vpack.c.bf16 %v1339_v7, %v1338_v5  ;;  %v147_v9 = vpop.f32.mrb[3].mxu0  ;;  %v760_v5 = vrot.slane %v745_v3, %v1676_v55 }
 0x112   :  { %v159_v10 = vpack.c.bf16 %v147_v9, %v144_v6  ;;  %v799_v6 = vld [vmem:[#allocation3 + $0xc] sm:$0x3]  ;;  %v853_v9 = vld [vmem:[#allocation3 + $0xe] sm:$0x3] }
 0x113   :  { %v803_v7 = vrot.slane %v799_v6, %v1673_v54  ;;  %v868_v12 = vrot.slane %v853_v9, %v1676_v55 }
 0x114   :  { %1340 = vmatprep.subr.bf16.mxu1 %v159_v10 }
 0x115   :  { %1341 = vmatpush3.bf16.msra.mxu1 %v159_v10  ;;  %v857_v10 = vrot.slane %v853_v9, %v1673_v54 }
 0x116   :  { %1342 = vmatprep.subr.bf16.mxu1 %v160_v8 }
 0x119   :  { %1343 = vmatpush3.bf16.msra.mxu1 %v160_v8  ;;  %v814_v8 = vrot.slane %v799_v6, %v1676_v55 }
 0x11c   :  { %1345 = vmatmul.mubr.msk.bf16.vlgmr.msra.gmra.mrb[0].mxu1 %vm171_vm2, %v1643_v11 }
 0x11d   :  { %1358 = vmatprep.mubr.msk.bf16.mxu1 %vm171_vm2, %v1394_v4 }
 0x1ef   :  { %v1346_v14 = vpop.f32.mrb[0].mxu1 }
 0x1f0   :  { %v221_v15 = vadd.f32 %v1346_v14, %v76_v13  ;;  %v212_v16 = vpop.f32.mrb[1].mxu1 }
 0x1f1   :  { %v213_v17 = vadd.f32 %v212_v16, %v76_v13  ;;  %v1347_v18 = vpop.f32.mrb[2].mxu1 }
 0x1f2   :  { %v224_v19 = vadd.f32 %v1347_v18, %v76_v13  ;;  %v215_v20 = vpop.f32.mrb[3].mxu1  ;;  %v229_v22 = vmax.f32 %v221_v15, 0.0 }
 0x1f3   :  { %v216_v21 = vadd.f32 %v215_v20, %v76_v13  ;;  %v227_v24 = vmax.f32 %v213_v17, 0.0  ;;  %v476_v13 = vld [vmem:[#allocation3] sm:$0x3] }
 0x1f4   :  { %v230_v23 = vmax.f32 %v224_v19, 0.0  ;;  %v480_v14 = vrot.slane %v476_v13, %v1673_v54  ;;  %v491_v15 = vrot.slane %v476_v13, %v1676_v55 }
 0x1f5   :  { %v228_v25 = vmax.f32 %v216_v21, 0.0 }
 0x1f6   :  { %v232_v26 = vpack.c.bf16 %v230_v23, %v229_v22  ;;  %v536_v22 = vpop.permute.xlu0 %535  ;;  %v547_v23 = vpop.permute.xlu1 %546 }
 0x1f7   :  { %v231_v27 = vpack.c.bf16 %v228_v25, %v227_v24 }
 0x1f9   :  { %1350 = vmatprep.mubr.msk.bf16.mxu0 %vm241_vm3, %v231_v27 }
 0x1fa   :  { %1351 = vmatmul.mubr.msk.bf16.vlgmr.msra.gmra.mrb[4].mxu0 %vm241_vm3, %v232_v26  ;;  %v1696_v24 = vpop.permute.xlu0 %539  ;;  %v1698_v25 = vpop.permute.xlu1 %550 }
 0x1fb   :  { %1363 = vmatpush3.bf16.msra.mxu0 %v1397_v34 }
 0x1fc   :  { %1364 = vmatprep.subr.bf16.mxu0 %v1398_v35 }
 0x1fe   :  { %v590_v26 = vpop.permute.xlu0 %589  ;;  %v594_v27 = vpop.permute.xlu1 %593 }
 0x1ff   :  { %1365 = vmatpush3.bf16.msra.mxu0 %v1398_v35  ;;  %v1410_v35 = vld [vmem:[#allocation7 + $0x2c] ss:$16 sps:$4 sm:$0xff]  }
 0x202   :  { %v605_v34 = vpop.permute.xlu1 %604 }
 0x2cd   :  { %v1352_v28 = vpop.f32.mrb[4].mxu0 }
 0x2ce   :  { %v282_v29 = vpop.f32.mrb[5].mxu0 }
 0x2cf   :  { %v1353_v30 = vpop.f32.mrb[6].mxu0 }
 0x2d0   :  { %v298_v31 = vpack.c.bf16 %v1353_v30, %v1352_v28  ;;  %v285_v32 = vpop.f32.mrb[7].mxu0  ;;  %v601_v28 = vpop.permute.xlu0 %600  ;;  %v1401_v30 = vld [vmem:[#allocation7 + $0x4] ss:$16 sps:$4 sm:$0xff]  }
 0x2d1   :  { %v297_v33 = vpack.c.bf16 %v285_v32, %v282_v29  ;;  %v1399_v29 = vld [vmem:[#allocation7] ss:$16 sps:$4 sm:$0xff]   ;;  %v1404_v32 = vld [vmem:[#allocation7 + $0xc] ss:$16 sps:$4 sm:$0xff]   ;;  %1123 = vmatprep.subr.bf16.mxu0 %v1401_v30 }
 0x2d3   :  { %1354 = vmatprep.subr.bf16.mxu1 %v297_v33 }
 0x2d4   :  { %1355 = vmatpush3.bf16.msra.mxu1 %v297_v33  ;;  %v1407_v33 = vld [vmem:[#allocation7 + $0x24] ss:$16 sps:$4 sm:$0xff]  }
 0x2d5   :  { %1356 = vmatprep.subr.bf16.mxu1 %v298_v31 }
 0x2d8   :  { %1357 = vmatpush3.bf16.msra.mxu1 %v298_v31  ;;  %v1402_v31 = vld [vmem:[#allocation7 + $0x8] ss:$16 sps:$4 sm:$0xff]  }
 0x2db   :  { %1359 = vmatmul.mubr.msk.bf16.vlgmr.msra.gmra.mrb[4].mxu1 %vm171_vm2, %v1643_v11 }
 0x2dc   :  { %1374 = vmatprep.mubr.msk.bf16.mxu1 %vm171_vm2, %v1394_v4  ;;  %v749_v4 = vrot.slane %v745_v3, %v1673_v54 }
 0x2de   :  { %751 = vbcast.lane.b32.xlu0 %v749_v4, 256  ;;  %755 = vbcast.lane.b32.xlu1 %v749_v4, 264 }
 0x2e2   :  { %762 = vbcast.lane.b32.xlu0 %v760_v5, 256  ;;  %766 = vbcast.lane.b32.xlu1 %v760_v5, 264 }
 0x2e6   :  { %805 = vbcast.lane.b32.xlu0 %v803_v7, 256  ;;  %809 = vbcast.lane.b32.xlu1 %v803_v7, 264 }
 0x2ea   :  { %816 = vbcast.lane.b32.xlu0 %v814_v8, 256  ;;  %820 = vbcast.lane.b32.xlu1 %v814_v8, 264 }
 0x2ee   :  { %859 = vbcast.lane.b32.xlu0 %v857_v10, 256  ;;  %863 = vbcast.lane.b32.xlu1 %v857_v10, 264 }
 0x2f2   :  { %870 = vbcast.lane.b32.xlu0 %v868_v12, 256  ;;  %874 = vbcast.lane.b32.xlu1 %v868_v12, 264 }
 0x2f6   :  { %482 = vbcast.lane.b32.xlu0 %v480_v14, 256  ;;  %486 = vbcast.lane.b32.xlu1 %v480_v14, 264 }
 0x2fa   :  { %493 = vbcast.lane.b32.xlu0 %v491_v15, 256  ;;  %497 = vbcast.lane.b32.xlu1 %v491_v15, 264 }
 0x3ae   :  { %v1360_v37 = vpop.f32.mrb[4].mxu1 }
 0x3af   :  { %v342_v38 = vadd.f32 %v1360_v37, %v77_v36  ;;  %v333_v39 = vpop.f32.mrb[5].mxu1  ;;  %v1700_v37 = vpop.permute.xlu0 %643 }
 0x3b0   :  { %v334_v40 = vadd.f32 %v333_v39, %v77_v36  ;;  %v1361_v41 = vpop.f32.mrb[6].mxu1 }
 0x3b1   :  { %v345_v42 = vadd.f32 %v1361_v41, %v77_v36  ;;  %v336_v43 = vpop.f32.mrb[7].mxu1  ;;  %v350_v45 = vmax.f32 %v342_v38, 0.0  ;;  %v1702_v38 = vpop.permute.xlu1 %647 }
 0x3b2   :  { %v337_v44 = vadd.f32 %v336_v43, %v77_v36  ;;  %v348_v47 = vmax.f32 %v334_v40, 0.0  ;;  %v1408_v36 = vld [vmem:[#allocation7 + $0x28] ss:$16 sps:$4 sm:$0xff]  }
 0x3b3   :  { %v351_v46 = vmax.f32 %v345_v42, 0.0  ;;  %v1704_v39 = vpop.permute.xlu0 %654 }
 0x3b4   :  { %v349_v48 = vmax.f32 %v337_v44, 0.0 }
 0x3b5   :  { %v353_v49 = vpack.c.bf16 %v351_v46, %v350_v45  ;;  %v1706_v40 = vpop.permute.xlu1 %658 }
 0x3b6   :  { %v352_v50 = vpack.c.bf16 %v349_v48, %v348_v47 }
 0x3b7   :  { %v698_v41 = vpop.permute.xlu0 %697 }
 0x3b8   :  { %1366 = vmatprep.mubr.msk.bf16.mxu0 %vm171_vm2, %v352_v50 }
 0x3b9   :  { %1367 = vmatmul.mubr.msk.bf16.vlgmr.msra.gmra.mrb[8].mxu0 %vm171_vm2, %v353_v49  ;;  %v702_v42 = vpop.permute.xlu1 %701 }
 0x3ba   :  { %1124 = vmatpush1.bf16.msra.mxu0 %v1399_v29 }
 0x3bb   :  { %1125 = vmatprep.subr.bf16.mxu0 %v1407_v33  ;;  %v709_v43 = vpop.permute.xlu0 %708 }
 0x3bd   :  { %v713_v44 = vpop.permute.xlu1 %712 }
 0x3bf   :  { %v1708_v45 = vpop.permute.xlu0 %751 }
 0x3c1   :  { %v1710_v46 = vpop.permute.xlu1 %755 }
 0x3c3   :  { %v1712_v47 = vpop.permute.xlu0 %762 }
 0x3c5   :  { %v1714_v48 = vpop.permute.xlu1 %766 }
 0x3c7   :  { %v1716_v49 = vpop.permute.xlu0 %805 }
 0x3c9   :  { %v1718_v50 = vpop.permute.xlu1 %809 }
 0x3cb   :  { %v1720_v51 = vpop.permute.xlu0 %816 }
 0x3cd   :  { %v1722_v53 = vpop.permute.xlu1 %820 }
 0x3cf   :  { %v1724_v56 = vpop.permute.xlu0 %859 }
 0x3d1   :  { %v1726_v57 = vpop.permute.xlu1 %863 }
 0x3d3   :  { %v1728_v58 = vpop.permute.xlu0 %870 }
 0x3d5   :  { %v1730_v59 = vpop.permute.xlu1 %874 }
 0x3d7   :  { %v1732_v60 = vpop.permute.xlu0 %482 }
 0x3d9   :  { %v1734_v61 = vpop.permute.xlu1 %486 }
 0x3db   :  { %v494_v0 = vpop.permute.xlu0 %493 }
 0x3dd   :  { %v498_v5 = vpop.permute.xlu1 %497 }
 0x48c   :  { %v1368_v16 = vpop.f32.mrb[8].mxu0 }
 0x48d   :  { %v410_v17 = vpop.f32.mrb[9].mxu0 }
 0x48e   :  { %v1369_v18 = vpop.f32.mrb[10].mxu0 }
 0x48f   :  { %v426_v19 = vpack.c.bf16 %v1369_v18, %v1368_v16  ;;  %v413_v20 = vpop.f32.mrb[11].mxu0 }
 0x490   :  { %v425_v21 = vpack.c.bf16 %v413_v20, %v410_v17 }
 0x492   :  { %1370 = vmatprep.subr.bf16.mxu1 %v425_v21 }
 0x493   :  { %1371 = vmatpush3.bf16.msra.mxu1 %v425_v21 }
 0x494   :  { %1372 = vmatprep.subr.bf16.mxu1 %v426_v19 }
 0x497   :  { %1373 = vmatpush3.bf16.msra.mxu1 %v426_v19 }
 0x498   :  { %1164 = vmatprep.subr.bf16.mxu1 %v1404_v32 }
 0x49a   :  { %1375 = vmatmul.mubr.msk.bf16.vlgmr.msra.gmra.mrb[8].mxu1 %vm171_vm2, %v1643_v11  ;;  %v1405_v11 = vld [vmem:[#allocation7 + $0x20] ss:$16 sps:$4 sm:$0xff]  }
 0x49b   :  { %1165 = vmatpush1.bf16.msra.mxu1 %v1402_v31  ;;  %1126 = vmatpush1.bf16.msra.mxu0 %v1405_v11 }
 0x49c   :  { %1166 = vmatprep.subr.bf16.mxu1 %v1410_v35 }
 0x49f   :  { %1167 = vmatpush1.bf16.msra.mxu1 %v1408_v36 }
 0x56d   :  { %v1376_v63 = vpop.f32.mrb[8].mxu1 }
 0x56e   :  { %v1739_v1 = vadd.f32 %v1376_v63, %v78_v62  ;;  %v461_v2 = vpop.f32.mrb[9].mxu1 }
 0x56f   :  { %v1741_v3 = vadd.f32 %v461_v2, %v78_v62  ;;  %v1377_v4 = vpop.f32.mrb[10].mxu1 }
 0x570   :  { %v1743_v6 = vadd.f32 %v1377_v4, %v78_v62  ;;  %v501_v7 = vadd.f32 %v494_v0, %v1739_v1  ;;  %v464_v8 = vpop.f32.mrb[11].mxu1  ;;  %v608_v9 = vadd.f32 %v601_v28, %v1739_v1  ;;  %v554_v10 = vadd.f32 %v547_v23, %v1739_v1 }
 0x571   :  { %v1748_v12 = vadd.f32 %v464_v8, %v78_v62  ;;  %v606_v13 = vadd.f32 %v590_v26, %v1741_v3  ;;  %v552_v14 = vadd.f32 %v536_v22, %v1741_v3  ;;  %v714_v15 = vadd.f32 %v698_v41, %v1741_v3  ;;  %v1411_v8 = vld [vmem:[#allocation7 + $0x40] ss:$16 sps:$4 sm:$0xff]  }
 0x572   :  { %v512_v16 = vsel %vm241_vm3, %v501_v7, -inf  ;;  %v502_v17 = vadd.f32 %v498_v5, %v1743_v6  ;;  %v609_v18 = vadd.f32 %v605_v34, %v1743_v6  ;;  %v619_v19 = vsel %vm241_vm3, %v608_v9, -inf  ;;  %v1413_v9 = vld [vmem:[#allocation7 + $0x44] ss:$16 sps:$4 sm:$0xff]  }
 0x573   :  { %v607_v20 = vadd.f32 %v594_v27, %v1748_v12  ;;  %v610_v21 = vsel %vm241_vm3, %v606_v13, -inf  ;;  %v553_v23 = vadd.f32 %v1696_v24, %v1748_v12  ;;  %v555_v22 = vadd.f32 %v1698_v25, %v1743_v6  ;;  %1127 = vmatprep.subr.bf16.mxu0 %v1413_v9 }
 0x574   :  { %v513_v26 = vsel %vm241_vm3, %v502_v17, -inf  ;;  %v620_v28 = vsel %vm241_vm3, %v609_v18, -inf  ;;  %v556_v29 = vsel %vm241_vm3, %v552_v14, -inf  ;;  %v565_v30 = vsel %vm241_vm3, %v554_v10, -inf  ;;  %1128 = vmatpush1.bf16.msra.mxu0 %v1411_v8 }
 0x575   :  { %v514_v31 = vmax.f32 %v512_v16, %v513_v26  ;;  %v611_v32 = vsel %vm241_vm3, %v607_v20, -inf  ;;  %v621_v27 = vmax.f32 %v619_v19, %v620_v28  ;;  %v557_v33 = vsel %vm241_vm3, %v553_v23, -inf  ;;  %v1416_v16 = vld [vmem:[#allocation7 + $0x4c] ss:$16 sps:$4 sm:$0xff]  }
 0x576   :  { %v612_v34 = vmax.f32 %v610_v21, %v611_v32  ;;  %v558_v35 = vmax.f32 %v556_v29, %v557_v33  ;;  %v566_v24 = vsel %vm241_vm3, %v555_v22, -inf  ;;  %v715_v25 = vadd.f32 %v702_v42, %v1748_v12  ;;  %v1414_v42 = vld [vmem:[#allocation7 + $0x48] ss:$16 sps:$4 sm:$0xff]   ;;  %1168 = vmatprep.subr.bf16.mxu1 %v1416_v16 }
 0x577   :  { %v622_v11 = vrot.slane %v621_v27, 4  ;;  %v567_v36 = vmax.f32 %v565_v30, %v566_v24  ;;  %v716_v41 = vadd.f32 %v709_v43, %v1739_v1  ;;  %v717_v0 = vadd.f32 %v713_v44, %v1743_v6  ;;  %1169 = vmatpush1.bf16.msra.mxu1 %v1414_v42 }
 0x578   :  { %v613_v62 = vrot.slane %v612_v34, 4  ;;  %v559_v63 = vrot.slane %v558_v35, 4  ;;  %v718_v2 = vsel %vm241_vm3, %v714_v15, -inf  ;;  %v719_v7 = vsel %vm241_vm3, %v715_v25, -inf }
 0x579   :  { %v623_v4 = vmax.f32 %v621_v27, %v622_v11  ;;  %v568_v5 = vrot.slane %v567_v36, 4  ;;  %v720_v14 = vmax.f32 %v718_v2, %v719_v7  ;;  %v727_v43 = vsel %vm241_vm3, %v716_v41, -inf }
 0x57a   :  { %v614_v10 = vmax.f32 %v612_v34, %v613_v62  ;;  %v560_v13 = vmax.f32 %v558_v35, %v559_v63  ;;  %v728_v19 = vsel %vm241_vm3, %v717_v0, -inf  ;;  %v515_v23 = vrot.slane %v514_v31, 4 }
 0x57b   :  { %v624_v17 = vrot.slane %v623_v4, 2  ;;  %v569_v18 = vmax.f32 %v567_v36, %v568_v5  ;;  %v721_v20 = vrot.slane %v720_v14, 4  ;;  %v729_v21 = vmax.f32 %v727_v43, %v728_v19 }
 0x57c   :  { %v615_v44 = vrot.slane %v614_v10, 2  ;;  %v561_v15 = vrot.slane %v560_v13, 2  ;;  %v660_v34 = vadd.f32 %v1700_v37, %v1741_v3  ;;  %v661_v35 = vadd.f32 %v1702_v38, %v1748_v12 }
 0x57d   :  { %v625_v22 = vmax.f32 %v623_v4, %v624_v17  ;;  %v570_v26 = vrot.slane %v569_v18, 2  ;;  %v722_v30 = vmax.f32 %v720_v14, %v721_v20  ;;  %v730_v32 = vrot.slane %v729_v21, 4 }
 0x57e   :  { %v616_v28 = vmax.f32 %v614_v10, %v615_v44  ;;  %v562_v29 = vmax.f32 %v560_v13, %v561_v15  ;;  %v1781_v41 = vmax.f32 %v514_v31, %v515_v23  ;;  %v662_v0 = vadd.f32 %v1704_v39, %v1739_v1 }
 0x57f   :  { %v626_v27 = vrot.slane %v625_v22, 1  ;;  %v571_v33 = vmax.f32 %v569_v18, %v570_v26  ;;  %v723_v11 = vrot.slane %v722_v30, 2  ;;  %v731_v36 = vmax.f32 %v729_v21, %v730_v32 }
 0x580   :  { %v617_v24 = vrot.slane %v616_v28, 1  ;;  %v563_v25 = vrot.slane %v562_v29, 1  ;;  %v663_v37 = vadd.f32 %v1706_v40, %v1743_v6  ;;  %v664_v38 = vsel %vm241_vm3, %v660_v34, -inf }
 0x581   :  { %v627_v62 = vmax.f32 %v625_v22, %v626_v27  ;;  %v572_v63 = vrot.slane %v571_v33, 1  ;;  %v724_v5 = vmax.f32 %v722_v30, %v723_v11  ;;  %v732_v7 = vrot.slane %v731_v36, 2 }
 0x582   :  { %v618_v2 = vmax.f32 %v616_v28, %v617_v24  ;;  %v564_v4 = vmax.f32 %v562_v29, %v563_v25  ;;  %v665_v9 = vsel %vm241_vm3, %v661_v35, -inf  ;;  %v673_v42 = vsel %vm241_vm3, %v662_v0, -inf  ;;  %v1417_v28 = vld [vmem:[#allocation7 + $0x60] ss:$16 sps:$4 sm:$0xff]   ;;  %v1419_v29 = vld [vmem:[#allocation7 + $0x64] ss:$16 sps:$4 sm:$0xff]  }
 0x583   :  { %v573_v8 = vmax.f32 %v571_v33, %v572_v63  ;;  %v725_v10 = vrot.slane %v724_v5, 1  ;;  %v733_v13 = vmax.f32 %v731_v36, %v732_v7  ;;  %v666_v14 = vmax.f32 %v664_v38, %v665_v9  ;;  %1129 = vmatprep.subr.bf16.mxu0 %v1419_v29  ;;  %v1422_v24 = vld [vmem:[#allocation7 + $0x6c] ss:$16 sps:$4 sm:$0xff]  }
 0x584   :  { %v630_v31 = vsel %vm523_vm4, %v627_v62, %v618_v2  ;;  %v674_v16 = vsel %vm241_vm3, %v663_v37, -inf  ;;  %v822_v40 = vadd.f32 %v1716_v49, %v1741_v3  ;;  %v823_v44 = vadd.f32 %v1718_v50, %v1748_v12  ;;  %1130 = vmatpush1.bf16.msra.mxu0 %v1417_v28  ;;  %1170 = vmatprep.subr.bf16.mxu1 %v1422_v24 }
 0x585   :  { %631 = vrot.lane.b32.xlu1 %v630_v31, %s1523_s4  ;;  %v576_v39 = vsel %vm523_vm4, %v573_v8, %v564_v4  ;;  %v726_v17 = vmax.f32 %v724_v5, %v725_v10  ;;  %v734_v18 = vrot.slane %v733_v13, 1  ;;  %v667_v43 = vrot.slane %v666_v14, 4  ;;  %s1528_s4 = smov 64  }
 0x586   :  { %577 = vrot.lane.b32.xlu0 %v576_v39, %s1527_s12  ;;  %v675_v19 = vmax.f32 %v673_v42, %v674_v16  ;;  %v824_v15 = vadd.f32 %v1720_v51, %v1739_v1  ;;  %v825_v20 = vadd.f32 %v1722_v53, %v1743_v6  ;;  %v826_v21 = vsel %vm241_vm3, %v822_v40, -inf  ;;  %v1420_v53 = vld [vmem:[#allocation7 + $0x68] ss:$16 sps:$4 sm:$0xff]   ;;  %v1423_v16 = vld [vmem:[#allocation7 + $0x80] ss:$16 sps:$4 sm:$0xff]  }
 0x587   :  { %v735_v23 = vmax.f32 %v733_v13, %v734_v18  ;;  %v668_v22 = vmax.f32 %v666_v14, %v667_v43  ;;  %v768_v26 = vadd.f32 %v1708_v45, %v1741_v3  ;;  %v827_v30 = vsel %vm241_vm3, %v823_v44, -inf  ;;  %1171 = vmatpush1.bf16.msra.mxu1 %v1420_v53  ;;  %v1426_v44 = vld [vmem:[#allocation7 + $0x88] ss:$16 sps:$4 sm:$0xff]  }
 0x588   :  { %v676_v49 = vrot.slane %v675_v19, 4  ;;  %v835_v50 = vsel %vm241_vm3, %v824_v15, -inf  ;;  %v836_v32 = vsel %vm241_vm3, %v825_v20, -inf  ;;  %v769_v51 = vadd.f32 %v1710_v46, %v1748_v12 }
 0x589   :  { %v738_v27 = vsel %vm523_vm4, %v735_v23, %v726_v17  ;;  %v669_v33 = vrot.slane %v668_v22, 2  ;;  %v828_v35 = vmax.f32 %v826_v21, %v827_v30  ;;  %v837_v45 = vmax.f32 %v835_v50, %v836_v32  ;;  %v1428_v21 = vld [vmem:[#allocation7 + $0x8c] ss:$16 sps:$4 sm:$0xff]  }
 0x58a   :  { %v677_v34 = vmax.f32 %v675_v19, %v676_v49  ;;  %739 = vrot.lane.b32.xlu1 %v738_v27, %s1528_s4  ;;  %v770_v25 = vadd.f32 %v1712_v47, %v1739_v1  ;;  %v771_v11 = vadd.f32 %v1714_v48, %v1743_v6  ;;  %v772_v36 = vsel %vm241_vm3, %v768_v26, -inf  ;;  %v1425_v19 = vld [vmem:[#allocation7 + $0x84] ss:$16 sps:$4 sm:$0xff]   ;;  %1172 = vmatprep.subr.bf16.mxu1 %v1428_v21 }
 0x58b   :  { %v670_v46 = vmax.f32 %v668_v22, %v669_v33  ;;  %v829_v63 = vrot.slane %v828_v35, 4  ;;  %v773_v0 = vsel %vm241_vm3, %v769_v51, -inf  ;;  %v838_v2 = vrot.slane %v837_v45, 4  ;;  %1131 = vmatprep.subr.bf16.mxu0 %v1425_v19  ;;  %1173 = vmatpush1.bf16.msra.mxu1 %v1426_v44  ;;  %v1444_v19 = vld [vmem:[#allocation7 + $0xe8] ss:$16 sps:$4 sm:$0xff]  }
 0x58c   :  { %v678_v62 = vrot.slane %v677_v34, 2  ;;  %v774_v4 = vmax.f32 %v772_v36, %v773_v0  ;;  %v781_v5 = vsel %vm241_vm3, %v770_v25, -inf  ;;  %v782_v7 = vsel %vm241_vm3, %v771_v11, -inf  ;;  %1132 = vmatpush1.bf16.msra.mxu0 %v1423_v16  ;;  %v1429_v36 = vld [vmem:[#allocation7 + $0xa0] ss:$16 sps:$4 sm:$0xff]  }
 0x58d   :  { %v671_v47 = vrot.slane %v670_v46, 1  ;;  %v830_v37 = vmax.f32 %v828_v35, %v829_v63  ;;  %v783_v48 = vmax.f32 %v781_v5, %v782_v7  ;;  %v839_v38 = vmax.f32 %v837_v45, %v838_v2  ;;  %v1432_v63 = vld [vmem:[#allocation7 + $0xa8] ss:$16 sps:$4 sm:$0xff]   ;;  %v1434_v0 = vld [vmem:[#allocation7 + $0xac] ss:$16 sps:$4 sm:$0xff]  }
 0x58e   :  { %v679_v8 = vmax.f32 %v677_v34, %v678_v62  ;;  %v775_v9 = vrot.slane %v774_v4, 4  ;;  %v876_v31 = vadd.f32 %v1724_v56, %v1741_v3  ;;  %v877_v10 = vadd.f32 %v1726_v57, %v1748_v12  ;;  %1174 = vmatprep.subr.bf16.mxu1 %v1434_v0 }
 0x58f   :  { %v672_v13 = vmax.f32 %v670_v46, %v671_v47  ;;  %v831_v39 = vrot.slane %v830_v37, 2  ;;  %v784_v42 = vrot.slane %v783_v48, 4  ;;  %v840_v40 = vrot.slane %v839_v38, 2  ;;  %v1431_v46 = vld [vmem:[#allocation7 + $0xa4] ss:$16 sps:$4 sm:$0xff]   ;;  %1175 = vmatpush1.bf16.msra.mxu1 %v1432_v63 }
 0x590   :  { %v680_v14 = vrot.slane %v679_v8, 1  ;;  %v776_v17 = vmax.f32 %v774_v4, %v775_v9  ;;  %v878_v18 = vadd.f32 %v1728_v58, %v1739_v1  ;;  %v879_v43 = vadd.f32 %v1730_v59, %v1743_v6  ;;  %1133 = vmatprep.subr.bf16.mxu0 %v1431_v46  ;;  %v1437_v47 = vld [vmem:[#allocation7 + $0xc4] ss:$16 sps:$4 sm:$0xff]   ;;  %v1440_v9 = vld [vmem:[#allocation7 + $0xcc] ss:$16 sps:$4 sm:$0xff]  }
 0x591   :  { %v832_v56 = vmax.f32 %v830_v37, %v831_v39  ;;  %v785_v20 = vmax.f32 %v783_v48, %v784_v42  ;;  %v880_v57 = vsel %vm241_vm3, %v876_v31, -inf  ;;  %v841_v23 = vmax.f32 %v839_v38, %v840_v40  ;;  %1134 = vmatpush1.bf16.msra.mxu0 %v1429_v36  ;;  %v1438_v38 = vld [vmem:[#allocation7 + $0xc8] ss:$16 sps:$4 sm:$0xff]   ;;  %1176 = vmatprep.subr.bf16.mxu1 %v1440_v9  ;;  %v1446_v42 = vld [vmem:[#allocation7 + $0xec] ss:$16 sps:$4 sm:$0xff]  }
 0x592   :  { %v681_v15 = vmax.f32 %v679_v8, %v680_v14  ;;  %v777_v22 = vrot.slane %v776_v17, 2  ;;  %v881_v49 = vsel %vm241_vm3, %v877_v10, -inf  ;;  %v889_v26 = vsel %vm241_vm3, %v878_v18, -inf  ;;  %1135 = vmatprep.subr.bf16.mxu0 %v1437_v47 }
 0x593   :  { %v833_v1 = vrot.slane %v832_v56, 1  ;;  %v786_v28 = vrot.slane %v785_v20, 2  ;;  %v882_v59 = vmax.f32 %v880_v57, %v881_v49  ;;  %v842_v6 = vrot.slane %v841_v23, 1  ;;  %1177 = vmatpush1.bf16.msra.mxu1 %v1438_v38 }
 0x594   :  { %v684_v58 = vsel %vm523_vm4, %v681_v15, %v672_v13  ;;  %v778_v29 = vmax.f32 %v776_v17, %v777_v22  ;;  %v890_v30 = vsel %vm241_vm3, %v879_v43, -inf  ;;  %v500_v50 = vadd.f32 %v1734_v61, %v1748_v12  ;;  %v1443_v13 = vld [vmem:[#allocation7 + $0xe4] ss:$16 sps:$4 sm:$0xff]   ;;  %v1441_v17 = vld [vmem:[#allocation7 + $0xe0] ss:$16 sps:$4 sm:$0xff]   ;;  %1178 = vmatprep.subr.bf16.mxu1 %v1446_v42 }
 0x595   :  { %685 = vrot.lane.b32.xlu0 %v684_v58, %s1529_s21  ;;  %v834_v32 = vmax.f32 %v832_v56, %v833_v1  ;;  %v787_v51 = vmax.f32 %v785_v20, %v786_v28  ;;  %v883_v53 = vrot.slane %v882_v59, 4  ;;  %v891_v27 = vmax.f32 %v889_v26, %v890_v30 }
 0x596   :  { %v843_v33 = vmax.f32 %v841_v23, %v842_v6  ;;  %v779_v34 = vrot.slane %v778_v29, 1  ;;  %v504_v35 = vsel %vm241_vm3, %v500_v50, -inf  ;;  %v499_v11 = vadd.f32 %v1732_v60, %v1741_v3  ;;  %v1435_v60 = vld [vmem:[#allocation7 + $0xc0] ss:$16 sps:$4 sm:$0xff]  }
 0x597   :  { %v788_v24 = vrot.slane %v787_v51, 1  ;;  %v884_v45 = vmax.f32 %v882_v59, %v883_v53  ;;  %v892_v25 = vrot.slane %v891_v27, 4  ;;  %v517_v62 = vrot.slane %v1781_v41, 2  ;;  %1136 = vmatpush1.bf16.msra.mxu0 %v1435_v60  ;;  %1179 = vmatpush1.bf16.msra.mxu1 %v1444_v19  ;;  %v1259_v53 = vld [vmem:[%s1874_s8 + $0x3] ss:$8 sm:$0xf] }
 0x598   :  { %v846_v61 = vsel %vm523_vm4, %v843_v33, %v834_v32  ;;  %v780_v12 = vmax.f32 %v778_v29, %v779_v34  ;;  %v503_v7 = vsel %vm241_vm3, %v499_v11, -inf  ;;  %v1532_v16 = vmov 0   ;;  %1137 = vmatprep.subr.bf16.mxu0 %v1443_v13  ;;  %v907_v29 = vld [vmem:[%s1869_s3] sm:$0x3] }
 0x599   :  { %847 = vrot.lane.b32.xlu1 %v846_v61, %s1530_s22  ;;  %v789_v2 = vmax.f32 %v787_v51, %v788_v24  ;;  %v885_v4 = vrot.slane %v884_v45, 2  ;;  %v893_v5 = vmax.f32 %v891_v27, %v892_v25  ;;  %v505_v8 = vmax.f32 %v503_v7, %v504_v35  ;;  %1155 = vmatprep.mubr.bf16.mxu0 %v1532_v16  ;;  %v1260_v35 = vld [vmem:[%s1874_s8 + $0x4] ss:$8 sm:$0xf] }
 0x59a   :  { %v518_v31 = vmax.f32 %v1781_v41, %v517_v62  ;;  %1196 = vmatprep.mubr.bf16.mxu1 %v1532_v16  ;;  %v953_v51 = vsub.s32 2, %v1670_v52  ;;  %v957_v27 = vsub.s32 3, %v1670_v52  ;;  %v946_v33 = vrot.slane %v1259_v53, %v1673_v54 }
 0x59b   :  { %v792_v3 = vsel %vm523_vm4, %v789_v2, %v780_v12  ;;  %v886_v37 = vmax.f32 %v884_v45, %v885_v4  ;;  %v894_v48 = vrot.slane %v893_v5, 2  ;;  %v506_v10 = vrot.slane %v505_v8, 4  ;;  %1138 = vmatpush1.bf16.msra.mxu0 %v1441_v17 }
 0x59c   :  { %793 = vrot.lane.b32.xlu0 %v792_v3, %s1531_s23  ;;  %v519_v41 = vrot.slane %v518_v31, 1  ;;  %v954_v34 = vrot.slane %v1259_v53, %v953_v51  ;;  %v950_v24 = vrot.slane %v1259_v53, %v1676_v55  ;;  %v958_v45 = vrot.slane %v1259_v53, %v957_v27 }
 0x59d   :  { %v887_v14 = vrot.slane %v886_v37, 1  ;;  %v895_v39 = vmax.f32 %v893_v5, %v894_v48  ;;  %v507_v40 = vmax.f32 %v505_v8, %v506_v10  ;;  %v1213_v46 = vrot.slane %v1260_v35, %v1673_v54 }
 0x59e   :  { %v520_v57 = vmax.f32 %v518_v31, %v519_v41  ;;  %v1221_v63 = vrot.slane %v1260_v35, %v953_v51  ;;  %v1217_v0 = vrot.slane %v1260_v35, %v1676_v55  ;;  %v1225_v48 = vrot.slane %v1260_v35, %v957_v27 }
 0x59f   :  { %v888_v18 = vmax.f32 %v886_v37, %v887_v14  ;;  %v896_v43 = vrot.slane %v895_v39, 1  ;;  %v508_v44 = vrot.slane %v507_v40, 2 }
 0x5a1   :  { %v897_v15 = vmax.f32 %v895_v39, %v896_v43  ;;  %v509_v56 = vmax.f32 %v507_v40, %v508_v44  ;;  %v83_v40 = vld [vmem:[%s1874_s8 + $0x5] ss:$0 sm:$0xff] }
 0x5a3   :  { %v900_v20 = vsel %vm523_vm4, %v897_v15, %v888_v18  ;;  %v510_v21 = vrot.slane %v509_v56, 1 }
 0x5a4   :  { %901 = vrot.lane.b32.xlu0 %v900_v20, %s1533_s2 }
 0x5a5   :  { %v511_v23 = vmax.f32 %v509_v56, %v510_v21 }
 0x5a7   :  { %v524_v22 = vsel %vm523_vm4, %v520_v57, %v511_v23 }
 0x5a8   :  { %527 = vst.msk [vmem:[#allocation2] sm:$0x3] %vm526_vm5, %v524_v22 }
 0x5f7   :  { %v632_v49 = vpop.permute.xlu1 %631 }
 0x5f8   :  { %v578_v26 = vpop.permute.xlu0 %577 }
 0x5f9   :  { %581 = vst.msk [vmem:[#allocation2] sm:$0x3] %vm580_vm6, %v578_v26 }
 0x5fa   :  { %635 = vst.msk [vmem:[#allocation2] sm:$0x3] %vm634_vm7, %v632_v49 }
 0x5fc   :  { %v740_v58 = vpop.permute.xlu1 %739 }
 0x607   :  { %v686_v1 = vpop.permute.xlu0 %685 }
 0x608   :  { %689 = vst.msk [vmem:[#allocation2] sm:$0x3] %vm688_vm8, %v686_v1 }
 0x609   :  { %743 = vst.msk [vmem:[#allocation2] sm:$0x3] %vm742_vm9, %v740_v58 }
 0x60b   :  { %v848_v28 = vpop.permute.xlu1 %847 }
 0x60e   :  { %v794_v59 = vpop.permute.xlu0 %793 }
 0x60f   :  { %797 = vst.msk [vmem:[#allocation2] sm:$0x3] %vm796_vm10, %v794_v59 }
 0x610   :  { %851 = vst.msk [vmem:[#allocation2] sm:$0x3] %vm850_vm11, %v848_v28 }
 0x616   :  { %v902_v6 = vpop.permute.xlu0 %901 }
 0x617   :  { %905 = vst.msk [vmem:[#allocation2] sm:$0x3] %vm904_vm12, %v902_v6 }
 0x61e   :  { %v906_v30 = vld [vmem:[#allocation2] sm:$0x3] }
 0x61f   :  { %v908_v50 = vmul.f32 %v907_v29, %v906_v30 }
 0x621   :  { %v909_v32 = vpack.c.bf16 %v908_v50, %v908_v50 }
 0x623   :  { %1156 = vmatmul.mubr.bf16.vlgmr.msra.gmra.mrb[12].mxu0 %v909_v32  ;;  %1197 = vmatmul.mubr.bf16.vlgmr.msra.gmra.mrb[12].mxu1 %v909_v32 }
 0x6f6   :  { %v1157_v25 = vpop.f32.mrb[12].mxu0  ;;  %v1198_v11 = vpop.f32.mrb[12].mxu1 }
 0x6f7   :  { %v1158_v36 = vadd.f32 %v1157_v25, %v946_v33  ;;  %v1199_v62 = vadd.f32 %v1198_v11, %v954_v34  ;;  %v1159_v61 = vpop.f32.mrb[13].mxu0  ;;  %v1200_v12 = vpop.f32.mrb[13].mxu1 }
 0x6f8   :  { %v1160_v52 = vadd.f32 %v1159_v61, %v950_v24  ;;  %v1201_v2 = vadd.f32 %v1200_v12, %v958_v45  ;;  %v1161_v4 = vpop.f32.mrb[14].mxu0  ;;  %v1202_v5 = vpop.f32.mrb[14].mxu1 }
 0x6f9   :  { %v1205_v7 = vmax.f32 %v1158_v36, 0.0  ;;  %v1207_v47 = vmax.f32 %v1199_v62, 0.0  ;;  %v1162_v8 = vpop.f32.mrb[15].mxu0  ;;  %v1203_v60 = vpop.f32.mrb[15].mxu1 }
 0x6fa   :  { %v1206_v3 = vmax.f32 %v1160_v52, 0.0  ;;  %v1208_v37 = vmax.f32 %v1201_v2, 0.0 }
 0x6fb   :  { %v1230_v38 = vmul.f32 %v1213_v46, %v1205_v7  ;;  %v1232_v54 = vmul.f32 %v1221_v63, %v1207_v47 }
 0x6fc   :  { %v1231_v9 = vmul.f32 %v1217_v0, %v1206_v3  ;;  %v1233_v13 = vmul.f32 %v1225_v48, %v1208_v37 }
 0x6fd   :  { %v1235_v31 = vsel %vm1234_vm13, %v1230_v38, 0.0  ;;  %v1238_v39 = vsel %vm1234_vm13, %v1232_v54, 0.0 }
 0x6fe   :  { %v1236_v10 = vsel %vm1234_vm13, %v1231_v9, 0.0  ;;  %v1240_v42 = vsel %vm1234_vm13, %v1233_v13, 0.0 }
 0x6ff   :  { %v1237_v14 = vadd.f32 %v1236_v10, %v1235_v31 }
 0x701   :  { %v1239_v55 = vadd.f32 %v1238_v39, %v1237_v14 }
 0x703   :  { %v1241_v16 = vadd.f32 %v1240_v42, %v1239_v55 }
 0x705   :  { %1242 = vadd.xlane.f32.xlu1 %v1241_v16 }
 0x792   :  { %v1243_v17 = vpop.xlane.xlu1 %1242 }
 0x793   :  { %v1244_v18 = vadd.f32 %v1243_v17, %v83_v40 }
 0x795   :  { %v1245_v43 = vsub.f32 0.0, %v1244_v18 }
 0x797   :  { %v1246_v19 = vmul.f32 1.442695, %v1245_v43 }
 0x799   :  { %1447 = vpow2.f32 %v1246_v19 }
 0x7a3   :  { %v1448_v41 = vpop.eup %1447 }
 0x7a4   :  { %v1248_v44 = vadd.f32 1.0, %v1448_v41 }
 0x7a6   :  { %1449 = vrcp.f32 %v1248_v44 }
 0x7b0   :  { %v1450_v15 = vpop.eup %1449 }
 0x7b1   :  { %1252 = vst.msk [vmem:[%s1875_s9] sm:$0x3] %vm1251_vm14, %v1450_v15 }
 0x7b2   :  { %1257 = vsyncpa [#allocation4], 1 }
 0x7b3   :  { %1258 = vsyncpa [#allocation6], 1 }

</bundles_post_ra>
